<compile_context>
chip_gen: v7x
topology: tpu7x:2x2x1
jax: 0.10.0
libtpu: 0.0.40
codegen_flags: <defaults>
</compile_context>

<pallas_src>
import functools

import jax
import jax.numpy as jnp
from jax.experimental import pallas as pl
from jax.experimental.pallas import tpu as pltpu

_LANE = 128
_SUBLANE = 8


def _round_up(x, m):
    return (x + m - 1) // m * m


def _patch_embed_kernel(x_ref, w_ref, b_ref, o_ref):
    # x_ref: (tm, K) patch rows
    # w_ref: (K, E)  projection weight (reshaped conv weight)
    # b_ref: (1, E)  bias
    # o_ref: (tm, E)
    acc = jnp.dot(x_ref[...], w_ref[...], preferred_element_type=jnp.float32)
    o_ref[...] = (acc + b_ref[...].astype(jnp.float32)).astype(o_ref.dtype)


def _pick_m_tiling(M, max_tile_m):
    """Balanced, 8-aligned M tiles; even grid (>=2 steps) for v7x when M is big."""
    cap = max(_SUBLANE, _round_up(min(max_tile_m, M), _SUBLANE))
    grid_m = pl.cdiv(M, cap)
    if M >= 1024:
        grid_m = max(grid_m, 2)          # keep both v7x TensorCores busy
    if grid_m > 1 and grid_m % 2 == 1:
        grid_m += 1                      # balanced two-way split
    tm = _round_up(pl.cdiv(M, grid_m), _SUBLANE)
    grid_m = pl.cdiv(M, tm)
    return tm, grid_m


def patch_embed_forward(x, weight, bias, patch_size=4, *, tile_m=4096):
    """Pallas implementation of PatchEmbed.forward.

    Args:
      x:      (B, C, H, W) float32, NCHW like PyTorch.
      weight: (E, C, P, P) conv weight (stride == kernel_size == P).
      bias:   (E,) conv bias.
      tile_m: max patch-matrix rows per grid step.
    Returns:
      (tokens, Hp, Wp) where tokens is (B, Hp*Wp, E).  norm_layer=None -> Identity.
    """
    P = patch_size
    B, C, H, W = x.shape
    E = weight.shape[0]

    # --- padding (same semantics as F.pad(x, (0, pad_w, 0, pad_h))) --------
    pad_h = (-H) % P
    pad_w = (-W) % P
    if pad_h or pad_w:
        x = jnp.pad(x, ((0, 0), (0, 0), (0, pad_h), (0, pad_w)))
    H2, W2 = H + pad_h, W + pad_w
    Hp, Wp = H2 // P, W2 // P

    M = B * Hp * Wp
    K = C * P * P

    # --- patch matrix (layout glue; candidate for input fusion) ------------
    # (B, C, Hp, P, Wp, P) -> (B, Hp, Wp, C, P, P) -> (M, K)
    xp = x.reshape(B, C, Hp, P, Wp, P)
    xp = jnp.transpose(xp, (0, 2, 4, 1, 3, 5)).reshape(M, K)

    wmat = weight.reshape(E, K).T            # (K, E), unpadded
    bvec = bias.reshape(1, E)                # (1, E), unpadded

    # --- M tiling -----------------------------------------------------------
    tm, grid_m = _pick_m_tiling(M, tile_m)

    # Real (lane-padded) double-buffered VMEM footprint; K=48 / E=96 tiles
    # occupy 128 lanes per row in VMEM regardless of their logical width.
    x_buf = tm * _round_up(K, _LANE) * 4
    o_buf = tm * _round_up(E, _LANE) * 4
    w_buf = _round_up(K, _SUBLANE) * _round_up(E, _LANE) * 4
    b_buf = _SUBLANE * _round_up(E, _LANE) * 4
    footprint = 2 * (x_buf + o_buf + w_buf + b_buf)
    vmem_limit = int(min(max(32 << 20, 2 * footprint), 48 << 20))

    cost = pl.CostEstimate(
        flops=2 * M * K * E,
        transcendentals=0,
        bytes_accessed=4 * (M * K + K * E + E + M * E),
    )

    out = pl.pallas_call(
        _patch_embed_kernel,
        out_shape=jax.ShapeDtypeStruct((M, E), x.dtype),
        grid_spec=pltpu.PrefetchScalarGridSpec(
            num_scalar_prefetch=0,
            grid=(grid_m,),
            in_specs=[
                pl.BlockSpec((tm, K), lambda i: (i, 0)),
                pl.BlockSpec((K, E), lambda i: (0, 0)),
                pl.BlockSpec((1, E), lambda i: (0, 0)),
            ],
            out_specs=pl.BlockSpec((tm, E), lambda i: (i, 0)),
        ),
        compiler_params=pltpu.CompilerParams(
            dimension_semantics=("parallel",),
            # Allow XLA to fuse the patch-rearrange producer into the input
            # DMA so the patch matrix is (ideally) not materialized in HBM.
            allow_input_fusion=[True, False, False],
            vmem_limit_bytes=vmem_limit,
        ),
        cost_estimate=cost,
    )(xp, wmat, bvec)

    tokens = out.reshape(B, Hp * Wp, E)
    return tokens, Hp, Wp


def _reference(x, weight, bias, P):
    """Plain-JAX reference (pad + strided conv), matching the PyTorch module."""
    _, _, H, W = x.shape
    pad_h = (-H) % P
    pad_w = (-W) % P
    xpad = jnp.pad(x, ((0, 0), (0, 0), (0, pad_h), (0, pad_w)))
    y = jax.lax.conv_general_dilated(
        xpad, weight, window_strides=(P, P), padding="VALID",
        dimension_numbers=("NCHW", "OIHW", "NCHW"),
    ) + bias[None, :, None, None]
    B, E, Hp, Wp = y.shape
    return y.reshape(B, E, Hp * Wp).transpose(0, 2, 1), Hp, Wp


if __name__ == "__main__":
    # Module defaults: patch_size=4, in_c=3, embed_dim=96.
    key = jax.random.PRNGKey(0)
    k_x, k_w, k_b, k_x2 = jax.random.split(key, 4)

    P, C, E = 4, 3, 96
    weight = jax.random.normal(k_w, (E, C, P, P), dtype=jnp.float32) * 0.02
    bias = jax.random.normal(k_b, (E,), dtype=jnp.float32) * 0.02

    fwd = jax.jit(functools.partial(patch_embed_forward, patch_size=P))

    # Case 1: spatial dims divisible by the patch size (no pad path).
    x = jax.random.normal(k_x, (2, C, 16, 16), dtype=jnp.float32)
    tokens, Hp, Wp = fwd(x, weight, bias)
    jax.block_until_ready(tokens)
    ref, rHp, rWp = _reference(x, weight, bias, P)
    assert tokens.shape == (2, Hp * Wp, E), tokens.shape
    assert (Hp, Wp) == (rHp, rWp)
    assert jnp.allclose(tokens, ref, atol=1e-4, rtol=1e-4)

    # Case 2: non-divisible spatial dims (exercises the F.pad path).
    x2 = jax.random.normal(k_x2, (2, C, 15, 18), dtype=jnp.float32)
    tokens2, Hp2, Wp2 = fwd(x2, weight, bias)
    jax.block_until_ready(tokens2)
    ref2, rHp2, rWp2 = _reference(x2, weight, bias, P)
    assert tokens2.shape == (2, Hp2 * Wp2, E), tokens2.shape
    assert (Hp2, Wp2) == (rHp2, rWp2)
    assert jnp.allclose(tokens2, ref2, atol=1e-4, rtol=1e-4)

    print("KERNEL_OK")
</pallas_src>

<mosaic_0001>
module attributes {stable_mosaic.version = 11 : i64} {
  func.func @_patch_embed_kernel(%arg0: i32, %arg1: memref<32x48xf32, #tpu.memory_space<vmem>>, %arg2: memref<48x96xf32, #tpu.memory_space<vmem>>, %arg3: memref<1x96xf32, #tpu.memory_space<vmem>>, %arg4: memref<32x96xf32, #tpu.memory_space<vmem>>) attributes {dimension_semantics = [#tpu.dimension_semantics<parallel>], iteration_bounds = array<i64: 1>, scalar_prefetch = 0 : i64, scratch_operands = 0 : i64, tpu.core_type = #tpu.core_type<tc>, window_params = [{transform_indices = @transform_0, window_bounds = array<i64: 32, 48>}, {pipeline_mode = #tpu.pipeline_mode<synchronous>, transform_indices = @transform_1, window_bounds = array<i64: 48, 96>}, {pipeline_mode = #tpu.pipeline_mode<synchronous>, transform_indices = @transform_2, window_bounds = array<i64: 1, 96>}, {transform_indices = @transform_3, window_bounds = array<i64: 32, 96>}]} {
    %c0 = arith.constant 0 : index
    %c0_0 = arith.constant 0 : index
    %0 = vector.load %arg1[%c0, %c0_0] : memref<32x48xf32, #tpu.memory_space<vmem>>, vector<32x48xf32>
    %c0_1 = arith.constant 0 : index
    %c0_2 = arith.constant 0 : index
    %1 = vector.load %arg2[%c0_1, %c0_2] : memref<48x96xf32, #tpu.memory_space<vmem>>, vector<48x96xf32>
    %cst = arith.constant dense<0.000000e+00> : vector<32x96xf32>
    %2 = tpu.matmul %0, %1, %cst {dimension_numbers = #tpu.dot_dimension_numbers<[1], [0], [0], [1], [0, 0, 1, 1], [], []>} : vector<32x48xf32>, vector<48x96xf32>, vector<32x96xf32> -> vector<32x96xf32>
    %c0_3 = arith.constant 0 : index
    %c0_4 = arith.constant 0 : index
    %3 = vector.load %arg3[%c0_3, %c0_4] : memref<1x96xf32, #tpu.memory_space<vmem>>, vector<1x96xf32>
    %4 = vector.broadcast %3 : vector<1x96xf32> to vector<32x96xf32>
    %5 = arith.addf %2, %4 : vector<32x96xf32>
    %c0_5 = arith.constant 0 : index
    %c0_6 = arith.constant 0 : index
    %6 = vector.load %arg4[%c0_5, %c0_6] : memref<32x96xf32, #tpu.memory_space<vmem>>, vector<32x96xf32>
    tpu.vector_store %arg4[%c0_5, %c0_6], %5 {strides = array<i32>} : memref<32x96xf32, #tpu.memory_space<vmem>>, vector<32x96xf32>,
    return
  }
  func.func @transform_0(%arg0: i32) -> (i32, i32) {
    %c0_i32 = arith.constant 0 : i32
    %c0_i32_0 = arith.constant 0 : i32
    return %arg0, %c0_i32 : i32, i32
  }
  func.func @transform_1(%arg0: i32) -> (i32, i32) {
    %c0_i32 = arith.constant 0 : i32
    %c0_i32_0 = arith.constant 0 : i32
    %c0_i32_1 = arith.constant 0 : i32
    return %c0_i32, %c0_i32_0 : i32, i32
  }
  func.func @transform_2(%arg0: i32) -> (i32, i32) {
    %c0_i32 = arith.constant 0 : i32
    %c0_i32_0 = arith.constant 0 : i32
    %c0_i32_1 = arith.constant 0 : i32
    return %c0_i32, %c0_i32_0 : i32, i32
  }
  func.func @transform_3(%arg0: i32) -> (i32, i32) {
    %c0_i32 = arith.constant 0 : i32
    %c0_i32_0 = arith.constant 0 : i32
    return %arg0, %c0_i32 : i32, i32
  }
}

</mosaic_0001>

<bundles_post_ra>
// kernel: patch_embed_forward.1
= control target key start
LH: loop header
LB: loop body
LE: loop exit
PB: predicated region body
PF: predicated region fallthrough
CT: control target
= control target key end

     0   :  { %vm32_vm0 = vcmask 392192   ;;  %s301_s0 = inlined_call_operand.vmem [shape: f32[32,48], index: 0, kind: input, shape index: {}]   ;;  %s302_s1 = inlined_call_operand.vmem [shape: f32[48,96], index: 1, kind: input, shape index: {}]   ;;  %s303_s2 = inlined_call_operand.vmem [shape: f32[1,96], index: 2, kind: input, shape index: {}]   ;;  %s304_s3 = inlined_call_operand.hbm [shape: f32[32,96], index: 3, kind: output, shape index: {}]  }
   0x1   :  { %v19_v0 = vld [vmem:[%s302_s1] sm:$0xff]  ;;  %v20_v1 = vld [vmem:[%s302_s1 + $0x8] sm:$0xff]  ;;  %v21_v2 = vld [vmem:[%s302_s1 + $0x10] sm:$0xff] }
   0x2   :  { %v184_v3 = vpack.c.bf16 %v20_v1, %v19_v0  ;;  %v22_v4 = vld [vmem:[%s302_s1 + $0x18] sm:$0xff]  ;;  %v23_v6 = vld [vmem:[%s302_s1 + $0x20] sm:$0xff]  ;;  %v24_v7 = vld [vmem:[%s302_s1 + $0x28] sm:$0xff] }
   0x3   :  { %v188_v5 = vpack.c.bf16 %v22_v4, %v21_v2  ;;  %v15_v8 = vld [vmem:[%s301_s0] sm:$0xff]  ;;  %v17_v9 = vld [vmem:[%s301_s0 + $0x10] sm:$0xff] }
   0x4   :  { %185 = vmatprep.subr.bf16.mxu0 %v184_v3  ;;  %196 = vmatprep.subr.bf16.mxu1 %v184_v3 }
   0x5   :  { %8 = vsyncpa [#allocation3], 0  ;;  %187 = vmatpush3.bf16.msra.mxu0 %v184_v3  ;;  %199 = vmatpush3.bf16.msra.mxu1 %v184_v3  ;;  %v192_v10 = vpack.c.bf16 %v24_v7, %v23_v6  ;;  %v16_v11 = vld [vmem:[%s301_s0 + $0x8] sm:$0xff]  ;;  %v18_v12 = vld [vmem:[%s301_s0 + $0x18] sm:$0xff]  ;;  %s229_s6 = smov [#allocation2]   ;;  %vm130_vm1 = vcmask 785408  }
   0x6   :  { %189 = vmatprep.subr.bf16.mxu0 %v188_v5  ;;  %197 = vmatprep.subr.bf16.mxu1 %v188_v5  ;;  %v151_v13 = vld [vmem:[%s303_s2] ss:$0 sm:$0xff]  ;;  %s140_s7 = sshll.u32 %s229_s6, 4  ;;  %s141_s7 = int_to_ptr.vmem [resolvable:$true] %s140_s7 }
   0x7   :  { %178 = vmatprep.mubr.msk.f32.mxu0 %vm32_vm0, %v15_v8  ;;  %181 = vmatprep.mubr.msk.f32.mxu1 %vm32_vm0, %v17_v9  ;;  %s205_s0 = scalar_lea.vmem %s141_s7, 512  ;;  %p210_p1 = scmp.lt.s32.totalorder %s141_s7, %s141_s7 }
   0x8   :  { %p206_p0 = scmp.ne.s32.totalorder %s141_s7, %s205_s0  ;;  %p211_p2 = scmp.lt.s32.totalorder %s205_s0, %s205_s0 }
   0x9   :  { %191 = vmatpush3.bf16.msra.mxu0 %v188_v5  ;;  %200 = vmatpush3.bf16.msra.mxu1 %v188_v5 }
   0xa   :  { %193 = vmatprep.subr.bf16.mxu0 %v192_v10  ;;  %198 = vmatprep.subr.bf16.mxu1 %v192_v10  ;;  %p212_p3 = por %p211_p2, %p210_p1 }
   0xc   :  { %p213_p4 = pnand %p212_p3, %p206_p0 }
   0xd   :  { %195 = vmatpush3.bf16.msra.mxu0 %v192_v10  ;;  %201 = vmatpush3.bf16.msra.mxu1 %v192_v10 }
  0x10   :  { %179 = vmatmul.mubr.msk.f32.vlgmr.msra.gmra.mrb[0].mxu0 %vm32_vm0, %v16_v11  ;;  %182 = vmatmul.mubr.msk.f32.vlgmr.msra.gmra.mrb[0].mxu1 %vm32_vm0, %v18_v12 }
  0xe3   :  { %v180_v14 = vpop.f32.mrb[0].mxu0  ;;  %v183_v15 = vpop.f32.mrb[0].mxu1 }
  0xe4   :  { %v117_v16 = vadd.f32 %v180_v14, %v151_v13  ;;  %v127_v17 = vadd.f32 %v183_v15, %v151_v13  ;;  %v111_v18 = vpop.f32.mrb[1].mxu0  ;;  %v121_v19 = vpop.f32.mrb[1].mxu1 }
  0xe5   :  { %v112_v20 = vadd.f32 %v151_v13, %v111_v18  ;;  %v122_v21 = vadd.f32 %v151_v13, %v121_v19 }
  0xe6   :  { %132 = vst.msk [vmem:[#allocation2 + $0x8] sm:$0xff] %vm130_vm1, %v117_v16  ;;  %134 = vst.msk [vmem:[#allocation2 + $0x18] sm:$0xff] %vm130_vm1, %v127_v17 }
  0xe7   :  { %131 = vst.msk [vmem:[#allocation2] sm:$0xff] %vm130_vm1, %v112_v20  ;;  %133 = vst.msk [vmem:[#allocation2 + $0x10] sm:$0xff] %vm130_vm1, %v122_v21 }
  0xe8   :  { %216 = shalt.err (!%p213_p4)
}
  0xe9   :  { %s217_s9 = scalar_lea.hbm %s304_s3, 512 }
  0xea   :  { %p218_p5 = scmp.ne.s32.totalorder %s304_s3, %s217_s9  ;;  %p221_p6 = scmp.lt.u32.totalorder %s217_s9, %s304_s3 }
  0xec   :  { %p223_p7 = pnand %p221_p6, %p218_p5 }
  0xee   :  { %226 = shalt.err (!%p223_p7)
}
  0xef   :  { %s230_s14 = smov 128   ;;  %s231_s15 = smov 8  }
  0xf0   :  { %146 = dma.vmem_to_hbm [thread:$0]  %s141_s7, 512, %s304_s3, [#allocation3], %s230_s14, %s230_s14, %s231_s15  }
  0xf1   :  { %227 = dma.done.wait [#allocation3], 512  }
  0xf2   :  { %228 = vsyncadd [#allocation3], 4294966784 }
  0xf3   :  { %150 = vsyncpa [#allocation3], 1 }

</bundles_post_ra>
